<compile_context>
chip_gen: v5e
topology: v5e:2x2
jax: 0.10.0
libtpu: 0.0.40
codegen_flags: <defaults>
</compile_context>

<pallas_src>
import functools

import jax
import jax.numpy as jnp
from jax.experimental import pallas as pl
from jax.experimental.pallas import tpu as pltpu

LN_EPS = 1e-5


def _round_up(x: int, m: int) -> int:
    return ((x + m - 1) // m) * m


def mlp_head_kernel(x_ref, w1_ref, b1_ref, g_ref, beta_ref, w2_ref, b2_ref,
                    o_ref, *, d_h: int, d_h_pad: int):
    # x_ref:    (TN, D_in)      f32 (cast to bf16 in-register, no wrapper pass)
    # w1_ref:   (D_in, D_h_p)   bf16    b1/g/beta_ref: (1, D_h_p) f32
    # w2_ref:   (D_h_p, D_out_p) bf16   b2_ref: (1, D_out_p) f32
    # o_ref:    (TN, D_out_p)
    xb = x_ref[...].astype(jnp.bfloat16)

    # ---- Linear 1 (MXU, bf16 operands, f32 accumulation) ----
    h = jnp.dot(xb, w1_ref[...], preferred_element_type=jnp.float32) + b1_ref[...]

    # ---- LayerNorm over the true hidden width d_h (centred variance) ----
    # Padded hidden columns of h are exactly zero (zero-padded W1/b1), so the
    # row sum over the padded width equals the true sum.  After centring, each
    # padded column contributes exactly mean^2 to sum((h-mean)^2); we subtract
    # that closed-form correction (d_h_pad * mean^2) so the variance is taken
    # over the true d_h columns only.  Padded zero ROWS (ragged N tail) give a
    # finite-but-meaningless LN result which is sliced off by the wrapper.
    inv_dh = 1.0 / d_h
    mean = jnp.sum(h, axis=-1, keepdims=True) * inv_dh
    hc = h - mean
    s2 = jnp.sum(hc * hc, axis=-1, keepdims=True)
    var = jnp.maximum((s2 - d_h_pad * mean * mean) * inv_dh, 0.0)
    hn = hc * jax.lax.rsqrt(var + LN_EPS)
    # gamma is zero in padded columns -> they return to exactly 0 after affine.
    hn = hn * g_ref[...] + beta_ref[...]

    # ---- ReLU (f32 on the VPU) ----
    hr = jnp.maximum(hn, 0.0)

    # ---- Linear 2 (MXU, bf16 operands, f32 accumulation) ----
    out = jnp.dot(hr.astype(w2_ref.dtype), w2_ref[...],
                  preferred_element_type=jnp.float32) + b2_ref[...]
    o_ref[...] = out.astype(o_ref.dtype)


def prepare_mlp_head_params(w1, b1, gamma, beta, w2, b2):
    """Pad/cast parameters ONCE (not per forward call).

    - hidden dim padded to a multiple of 128 lanes (b1/gamma/beta zero-padded
      so LayerNorm + affine leave padded columns at exactly 0),
    - output dim lane-padded only when >= 64 (tiny heads write true width),
    - matmul weights cast to bf16 (MXU-native); biases / LN affine stay f32.
    """
    d_in, d_h = w1.shape
    d_out = w2.shape[1]
    d_h_p = _round_up(d_h, 128)
    d_out_p = d_out if (d_out < 64 or d_out % 128 == 0) else _round_up(d_out, 128)

    def pad2(a, rows, cols):
        return jnp.pad(a, ((0, rows - a.shape[0]), (0, cols - a.shape[1])))

    return dict(
        w1=pad2(w1, d_in, d_h_p).astype(jnp.bfloat16),
        b1=pad2(b1.reshape(1, d_h).astype(jnp.float32), 1, d_h_p),
        gamma=pad2(gamma.reshape(1, d_h).astype(jnp.float32), 1, d_h_p),
        beta=pad2(beta.reshape(1, d_h).astype(jnp.float32), 1, d_h_p),
        w2=pad2(w2, d_h_p, d_out_p).astype(jnp.bfloat16),
        b2=pad2(b2.reshape(1, d_out).astype(jnp.float32), 1, d_out_p),
        d_in=d_in, d_h=d_h, d_h_p=d_h_p, d_out=d_out, d_out_p=d_out_p,
    )


def _pick_tile_n(n_rows: int, max_tile: int = 512) -> int:
    # Aim for ~8 grid steps (>= 4 pipelined steps per TensorCore on v7x) while
    # keeping each tile a multiple of 16 rows (bf16 packs 2 rows / sublane)
    # and large enough to amortize the ~0.35us per-step overhead.
    t = _round_up(max(n_rows // 8, 16), 16)
    return max(16, min(t, max_tile))


def mlp_head(x, params, *, tile_n: int | None = None):
    """x: (N, d_in) -> (N, d_out) using pre-prepared (padded/cast) params."""
    N, d_in = x.shape
    assert d_in == params["d_in"], "input feature dim mismatch"
    d_h, d_h_p = params["d_h"], params["d_h_p"]
    d_out, d_out_p = params["d_out"], params["d_out_p"]
    out_dtype = x.dtype

    if tile_n is None:
        tile_n = _pick_tile_n(N)
    tile_n = max(16, _round_up(tile_n, 16))
    N_p = _round_up(N, tile_n)

    # x passes through with its true feature width; only a ragged row tail is
    # zero-padded (those rows' LN output is finite garbage and sliced off).
    xp = x if N_p == N else jnp.pad(x, ((0, N_p - N), (0, 0)))

    grid = (N_p // tile_n,)
    full = lambda i: (0, 0)

    # Resident weights: single-buffer them once they are big enough that the
    # default double-buffering of never-changing blocks would hurt VMEM
    # residency (matters on v7x's 64 MiB core as the head scales up).
    w_bytes = int(params["w1"].nbytes + params["w2"].nbytes + params["b1"].nbytes
                  + params["gamma"].nbytes + params["beta"].nbytes
                  + params["b2"].nbytes)
    resident_mode = pl.Buffered(1) if w_bytes > (8 << 20) else None

    x_isz = jnp.dtype(x.dtype).itemsize
    o_isz = jnp.dtype(out_dtype).itemsize
    vmem_est = (2 * tile_n * (d_in * x_isz + d_out_p * o_isz)          # I/O tiles (2x buffered)
                + (1 if resident_mode is not None else 2) * w_bytes    # resident weights
                + 4 * tile_n * d_h_p * 2)                              # f32 intermediates
    vmem_limit = (int(min(max(2 * vmem_est, 32 << 20), 100 << 20))
                  if vmem_est > (24 << 20) else None)

    cost = pl.CostEstimate(
        flops=int(2 * N_p * d_in * d_h_p + 2 * N_p * d_h_p * d_out_p
                  + 8 * N_p * d_h_p),
        transcendentals=int(N_p),
        bytes_accessed=int(xp.nbytes + w_bytes + N_p * d_out_p * o_isz),
    )

    kernel = functools.partial(mlp_head_kernel, d_h=d_h, d_h_pad=d_h_p - d_h)

    out = pl.pallas_call(
        kernel,
        out_shape=jax.ShapeDtypeStruct((N_p, d_out_p), out_dtype),
        grid_spec=pltpu.PrefetchScalarGridSpec(
            num_scalar_prefetch=0,
            grid=grid,
            in_specs=[
                pl.BlockSpec((tile_n, d_in), lambda i: (i, 0)),          # x tile (true width)
                pl.BlockSpec((d_in, d_h_p), full, pipeline_mode=resident_mode),   # W1
                pl.BlockSpec((1, d_h_p), full, pipeline_mode=resident_mode),      # b1
                pl.BlockSpec((1, d_h_p), full, pipeline_mode=resident_mode),      # gamma
                pl.BlockSpec((1, d_h_p), full, pipeline_mode=resident_mode),      # beta
                pl.BlockSpec((d_h_p, d_out_p), full, pipeline_mode=resident_mode),  # W2
                pl.BlockSpec((1, d_out_p), full, pipeline_mode=resident_mode),      # b2
            ],
            out_specs=pl.BlockSpec((tile_n, d_out_p), lambda i: (i, 0)),
        ),
        compiler_params=pltpu.CompilerParams(
            dimension_semantics=("parallel",),   # row tiles shard across TCs (v7x)
            vmem_limit_bytes=vmem_limit,
        ),
        cost_estimate=cost,
    )(xp, params["w1"], params["b1"], params["gamma"], params["beta"],
      params["w2"], params["b2"])

    if N_p != N or d_out_p != d_out:
        out = out[:N, :d_out]
    return out


def reference_mlp_head(x, w1, b1, gamma, beta, w2, b2):
    h = x @ w1 + b1
    mean = jnp.mean(h, axis=-1, keepdims=True)
    var = jnp.mean((h - mean) ** 2, axis=-1, keepdims=True)
    hn = (h - mean) / jnp.sqrt(var + LN_EPS)
    hn = hn * gamma + beta
    hr = jnp.maximum(hn, 0.0)
    return hr @ w2 + b2


if __name__ == "__main__":
    # Shapes consistent with the module's forward: (N, input_dim) tokens.
    N, input_dim, hidden_dim, output_dim = 1024, 64, 128, 16

    key = jax.random.PRNGKey(0)
    kx, kw1, kb1, kw2, kb2 = jax.random.split(key, 5)

    x = jax.random.normal(kx, (N, input_dim), dtype=jnp.float32)

    # Deterministic synthetic parameter init (module's weight_init is external).
    # LayerNorm starts at gamma=1, beta=0 like nn.LayerNorm.
    w1 = jax.random.normal(kw1, (input_dim, hidden_dim), dtype=jnp.float32) * 0.02
    b1 = jax.random.normal(kb1, (hidden_dim,), dtype=jnp.float32) * 0.02
    gamma = jnp.ones((hidden_dim,), dtype=jnp.float32)
    beta = jnp.zeros((hidden_dim,), dtype=jnp.float32)
    w2 = jax.random.normal(kw2, (hidden_dim, output_dim), dtype=jnp.float32) * 0.02
    b2 = jax.random.normal(kb2, (output_dim,), dtype=jnp.float32) * 0.02

    # Pad/cast parameters once (hoisted out of the per-call path).
    params = prepare_mlp_head_params(w1, b1, gamma, beta, w2, b2)

    out = mlp_head(x, params)
    out = jax.block_until_ready(out)

    # Reference evaluated on the same bf16-rounded matmul operands the kernel
    # consumes, so the comparison isolates kernel correctness from the
    # intentional bf16 casts (the kernel's extra hr->bf16 round is absorbed by
    # the tolerance).
    xr = x.astype(jnp.bfloat16).astype(jnp.float32)
    w1r = w1.astype(jnp.bfloat16).astype(jnp.float32)
    w2r = w2.astype(jnp.bfloat16).astype(jnp.float32)
    ref = reference_mlp_head(xr, w1r, b1, gamma, beta, w2r, b2)

    assert out.shape == (N, output_dim), out.shape
    max_err = jnp.max(jnp.abs(out - ref))
    assert max_err < 2e-2, f"mismatch vs reference: max abs err {max_err}"

    print("KERNEL_OK")
</pallas_src>

<mosaic_0001>
module attributes {stable_mosaic.version = 11 : i64} {
  func.func @mlp_head_kernel(%arg0: i32, %arg1: memref<128x64xf32, #tpu.memory_space<vmem>>, %arg2: memref<64x128xbf16, #tpu.memory_space<vmem>>, %arg3: memref<1x128xf32, #tpu.memory_space<vmem>>, %arg4: memref<1x128xf32, #tpu.memory_space<vmem>>, %arg5: memref<1x128xf32, #tpu.memory_space<vmem>>, %arg6: memref<128x16xbf16, #tpu.memory_space<vmem>>, %arg7: memref<1x16xf32, #tpu.memory_space<vmem>>, %arg8: memref<128x16xf32, #tpu.memory_space<vmem>>) attributes {dimension_semantics = [#tpu.dimension_semantics<parallel>], iteration_bounds = array<i64: 8>, scalar_prefetch = 0 : i64, scratch_operands = 0 : i64, tpu.core_type = #tpu.core_type<tc>, window_params = [{transform_indices = @transform_0, window_bounds = array<i64: 128, 64>}, {pipeline_mode = #tpu.pipeline_mode<synchronous>, transform_indices = @transform_1, window_bounds = array<i64: 64, 128>}, {pipeline_mode = #tpu.pipeline_mode<synchronous>, transform_indices = @transform_2, window_bounds = array<i64: 1, 128>}, {pipeline_mode = #tpu.pipeline_mode<synchronous>, transform_indices = @transform_3, window_bounds = array<i64: 1, 128>}, {pipeline_mode = #tpu.pipeline_mode<synchronous>, transform_indices = @transform_4, window_bounds = array<i64: 1, 128>}, {pipeline_mode = #tpu.pipeline_mode<synchronous>, transform_indices = @transform_5, window_bounds = array<i64: 128, 16>}, {pipeline_mode = #tpu.pipeline_mode<synchronous>, transform_indices = @transform_6, window_bounds = array<i64: 1, 16>}, {transform_indices = @transform_7, window_bounds = array<i64: 128, 16>}]} {
    %c0 = arith.constant 0 : index
    %c0_0 = arith.constant 0 : index
    %0 = vector.load %arg1[%c0, %c0_0] : memref<128x64xf32, #tpu.memory_space<vmem>>, vector<128x64xf32>
    %1 = arith.truncf %0 : vector<128x64xf32> to vector<128x64xbf16>
    %c0_1 = arith.constant 0 : index
    %c0_2 = arith.constant 0 : index
    %2 = vector.load %arg2[%c0_1, %c0_2] : memref<64x128xbf16, #tpu.memory_space<vmem>>, vector<64x128xbf16>
    %cst = arith.constant dense<0.000000e+00> : vector<128x128xf32>
    %3 = tpu.matmul %1, %2, %cst {dimension_numbers = #tpu.dot_dimension_numbers<[1], [0], [0], [1], [0, 0, 1, 1], [], []>} : vector<128x64xbf16>, vector<64x128xbf16>, vector<128x128xf32> -> vector<128x128xf32>
    %c0_3 = arith.constant 0 : index
    %c0_4 = arith.constant 0 : index
    %4 = vector.load %arg3[%c0_3, %c0_4] : memref<1x128xf32, #tpu.memory_space<vmem>>, vector<1x128xf32>
    %5 = vector.broadcast %4 : vector<1x128xf32> to vector<128x128xf32>
    %6 = arith.addf %3, %5 : vector<128x128xf32>
    %cst_5 = arith.constant dense<0.000000e+00> : vector<128xf32>
    %7 = vector.multi_reduction <add>, %6, %cst_5 [1] : vector<128x128xf32> to vector<128xf32>
    %8 = vector.shape_cast %7 : vector<128xf32> to vector<128x1xf32>
    %cst_6 = arith.constant 7.812500e-03 : f32
    %9 = vector.broadcast %cst_6 : f32 to vector<128x1xf32>
    %10 = arith.mulf %8, %9 : vector<128x1xf32>
    %11 = vector.broadcast %10 : vector<128x1xf32> to vector<128x128xf32>
    %12 = arith.subf %6, %11 : vector<128x128xf32>
    %13 = arith.mulf %12, %12 : vector<128x128xf32>
    %cst_7 = arith.constant dense<0.000000e+00> : vector<128xf32>
    %14 = vector.multi_reduction <add>, %13, %cst_7 [1] : vector<128x128xf32> to vector<128xf32>
    %15 = vector.shape_cast %14 : vector<128xf32> to vector<128x1xf32>
    %cst_8 = arith.constant 0.000000e+00 : f32
    %16 = vector.broadcast %cst_8 : f32 to vector<128x1xf32>
    %17 = arith.mulf %16, %10 : vector<128x1xf32>
    %18 = arith.mulf %17, %10 : vector<128x1xf32>
    %19 = arith.subf %15, %18 : vector<128x1xf32>
    %cst_9 = arith.constant 7.812500e-03 : f32
    %20 = vector.broadcast %cst_9 : f32 to vector<128x1xf32>
    %21 = arith.mulf %19, %20 : vector<128x1xf32>
    %cst_10 = arith.constant 0.000000e+00 : f32
    %22 = vector.broadcast %cst_10 : f32 to vector<128x1xf32>
    %23 = arith.maximumf %21, %22 : vector<128x1xf32>
    %cst_11 = arith.constant 9.99999974E-6 : f32
    %24 = vector.broadcast %cst_11 : f32 to vector<128x1xf32>
    %25 = arith.addf %23, %24 : vector<128x1xf32>
    %26 = math.rsqrt %25 : vector<128x1xf32>
    %27 = vector.broadcast %26 : vector<128x1xf32> to vector<128x128xf32>
    %28 = arith.mulf %12, %27 : vector<128x128xf32>
    %c0_12 = arith.constant 0 : index
    %c0_13 = arith.constant 0 : index
    %29 = vector.load %arg4[%c0_12, %c0_13] : memref<1x128xf32, #tpu.memory_space<vmem>>, vector<1x128xf32>
    %30 = vector.broadcast %29 : vector<1x128xf32> to vector<128x128xf32>
    %31 = arith.mulf %28, %30 : vector<128x128xf32>
    %c0_14 = arith.constant 0 : index
    %c0_15 = arith.constant 0 : index
    %32 = vector.load %arg5[%c0_14, %c0_15] : memref<1x128xf32, #tpu.memory_space<vmem>>, vector<1x128xf32>
    %33 = vector.broadcast %32 : vector<1x128xf32> to vector<128x128xf32>
    %34 = arith.addf %31, %33 : vector<128x128xf32>
    %cst_16 = arith.constant 0.000000e+00 : f32
    %35 = vector.broadcast %cst_16 : f32 to vector<128x128xf32>
    %36 = arith.maximumf %34, %35 : vector<128x128xf32>
    %37 = arith.truncf %36 : vector<128x128xf32> to vector<128x128xbf16>
    %c0_17 = arith.constant 0 : index
    %c0_18 = arith.constant 0 : index
    %38 = vector.load %arg6[%c0_17, %c0_18] : memref<128x16xbf16, #tpu.memory_space<vmem>>, vector<128x16xbf16>
    %cst_19 = arith.constant dense<0.000000e+00> : vector<128x16xf32>
    %39 = tpu.matmul %37, %38, %cst_19 {dimension_numbers = #tpu.dot_dimension_numbers<[1], [0], [0], [1], [0, 0, 1, 1], [], []>} : vector<128x128xbf16>, vector<128x16xbf16>, vector<128x16xf32> -> vector<128x16xf32>
    %c0_20 = arith.constant 0 : index
    %c0_21 = arith.constant 0 : index
    %40 = vector.load %arg7[%c0_20, %c0_21] : memref<1x16xf32, #tpu.memory_space<vmem>>, vector<1x16xf32>
    %41 = vector.broadcast %40 : vector<1x16xf32> to vector<128x16xf32>
    %42 = arith.addf %39, %41 : vector<128x16xf32>
    %c0_22 = arith.constant 0 : index
    %c0_23 = arith.constant 0 : index
    %43 = vector.load %arg8[%c0_22, %c0_23] : memref<128x16xf32, #tpu.memory_space<vmem>>, vector<128x16xf32>
    tpu.vector_store %arg8[%c0_22, %c0_23], %42 {strides = array<i32>} : memref<128x16xf32, #tpu.memory_space<vmem>>, vector<128x16xf32>,
    return
  }
  func.func @transform_0(%arg0: i32) -> (i32, i32) {
    %c0_i32 = arith.constant 0 : i32
    %c0_i32_0 = arith.constant 0 : i32
    return %arg0, %c0_i32 : i32, i32
  }
  func.func @transform_1(%arg0: i32) -> (i32, i32) {
    %c0_i32 = arith.constant 0 : i32
    %c0_i32_0 = arith.constant 0 : i32
    %c0_i32_1 = arith.constant 0 : i32
    return %c0_i32, %c0_i32_0 : i32, i32
  }
  func.func @transform_2(%arg0: i32) -> (i32, i32) {
    %c0_i32 = arith.constant 0 : i32
    %c0_i32_0 = arith.constant 0 : i32
    %c0_i32_1 = arith.constant 0 : i32
    return %c0_i32, %c0_i32_0 : i32, i32
  }
  func.func @transform_3(%arg0: i32) -> (i32, i32) {
    %c0_i32 = arith.constant 0 : i32
    %c0_i32_0 = arith.constant 0 : i32
    %c0_i32_1 = arith.constant 0 : i32
    return %c0_i32, %c0_i32_0 : i32, i32
  }
  func.func @transform_4(%arg0: i32) -> (i32, i32) {
    %c0_i32 = arith.constant 0 : i32
    %c0_i32_0 = arith.constant 0 : i32
    %c0_i32_1 = arith.constant 0 : i32
    return %c0_i32, %c0_i32_0 : i32, i32
  }
  func.func @transform_5(%arg0: i32) -> (i32, i32) {
    %c0_i32 = arith.constant 0 : i32
    %c0_i32_0 = arith.constant 0 : i32
    %c0_i32_1 = arith.constant 0 : i32
    return %c0_i32, %c0_i32_0 : i32, i32
  }
  func.func @transform_6(%arg0: i32) -> (i32, i32) {
    %c0_i32 = arith.constant 0 : i32
    %c0_i32_0 = arith.constant 0 : i32
    %c0_i32_1 = arith.constant 0 : i32
    return %c0_i32, %c0_i32_0 : i32, i32
  }
  func.func @transform_7(%arg0: i32) -> (i32, i32) {
    %c0_i32 = arith.constant 0 : i32
    %c0_i32_0 = arith.constant 0 : i32
    return %arg0, %c0_i32 : i32, i32
  }
}

</mosaic_0001>

<bundles_post_ra>
// kernel: tpu_custom_call.1
= control target key start
LH: loop header
LB: loop body
LE: loop exit
PB: predicated region body
PF: predicated region fallthrough
CT: control target
= control target key end

     0   :  { %s1238_s24 = smov 0   ;;  %s1792_s0 = inlined_call_operand.vmem [shape: f32[1024,64], index: 0, kind: input, shape index: {}]   ;;  %s1793_s1 = inlined_call_operand.vmem [shape: bf16[64,128], index: 1, kind: input, shape index: {}]   ;;  %s1794_s2 = inlined_call_operand.vmem [shape: f32[1,128], index: 2, kind: input, shape index: {}]   ;;  %s1795_s3 = inlined_call_operand.vmem [shape: f32[1,128], index: 3, kind: input, shape index: {}]   ;;  %s1796_s4 = inlined_call_operand.vmem [shape: f32[1,128], index: 4, kind: input, shape index: {}]   ;;  %s1797_s5 = inlined_call_operand.vmem [shape: bf16[128,16], index: 5, kind: input, shape index: {}]   ;;  %s1798_s6 = inlined_call_operand.vmem [shape: f32[1,16], index: 6, kind: input, shape index: {}]   ;;  %s1799_s7 = inlined_call_operand.vmem [shape: f32[1024,16], index: 7, kind: output, shape index: {}]  }
   0x1 LB: > { %s1055_s25 = sadd.s32 4294967295, %s1196_s24   ;;  %p1059_p0 = scmp.ge.s32.totalorder %s1196_s24, 1  ;;  %s1196_s24 = sphi %s1238_s24, %s17_s24  }
   0x2   : > { %p238_p1 = scmp.lt.s32.totalorder %s1196_s24, 9 }
   0x4   : > { %p239_p2 = pnand %p1059_p0, %p238_p1 }
   0x5   : > { %s1060_s28 = sshll.u32 (!%p239_p2), %s1055_s25, 4 }
   0x6   : > { %242 = sbr.rel (%p239_p2) target bundleno = 768 (0x300), region = 48  ;;  %p271_p3 = scmp.lt.s32.totalorder (!%p239_p2), %s1060_s28, 127 }
   0xb   : > { %v1125_v0 = vld [vmem:[%s1793_s1 + $0x18] sm:$0xff]  ;;  %v1124_v1 = vld [vmem:[%s1793_s1 + $0x10] sm:$0xff]  ;;  %s1811_s28 = smov (!%p271_p3, %s1060_s28), 127  ;;  %v1123_v2 = vld [vmem:[%s1793_s1 + $0x8] sm:$0xff]  ;;  %vm343_vm0 = vcmask 523264  }
   0xc   : > { %372 = vmatpush.bf16.msra.mxu0 %v1125_v0  ;;  %1134 = vmatpush.bf16.msra.mxu3 %v1125_v0  ;;  %s1061_s8 = sshll.u32 %s1811_s28, 3  ;;  %v1122_v3 = vld [vmem:[%s1793_s1] sm:$0xff] }
   0xd   : > { %s1263_s13 = scalar_lea.vmem %s1792_s0, %s1061_s8  ;;  %v1295_v28 = vld [vmem:[%s1794_s2] ss:$0 sm:$0xff]  ;;  %s1729_s22 = scalar_lea.vmem %s1799_s7, %s1061_s8 }
   0xe   : > { %v283_v4 = vld [vmem:[%s1263_s13] sm:$0xff]  ;;  %v284_v5 = vld [vmem:[%s1263_s13 + $0x8] sm:$0xff]  ;;  %v293_v6 = vld [vmem:[%s1263_s13 + $0x50] sm:$0xff] }
   0xf   : > { %v294_v7 = vld [vmem:[%s1263_s13 + $0x58] sm:$0xff]  ;;  %v299_v8 = vpack.c.bf16 %v284_v5, %v283_v4  ;;  %v285_v10 = vld [vmem:[%s1263_s13 + $0x10] sm:$0xff]  ;;  %v295_v12 = vld [vmem:[%s1263_s13 + $0x60] sm:$0xff] }
  0x10   : > { %373 = vmatpush.bf16.msra.mxu0 %v1124_v1  ;;  %1135 = vmatpush.bf16.msra.mxu3 %v1124_v1  ;;  %v304_v9 = vpack.c.bf16 %v294_v7, %v293_v6  ;;  %v286_v11 = vld [vmem:[%s1263_s13 + $0x18] sm:$0xff]  ;;  %v296_v13 = vld [vmem:[%s1263_s13 + $0x68] sm:$0xff]  ;;  %v287_v16 = vld [vmem:[%s1263_s13 + $0x20] sm:$0xff] }
  0x11   : > { %v300_v14 = vpack.c.bf16 %v286_v11, %v285_v10  ;;  %v305_v15 = vpack.c.bf16 %v296_v13, %v295_v12  ;;  %v288_v17 = vld [vmem:[%s1263_s13 + $0x28] sm:$0xff]  ;;  %v297_v18 = vld [vmem:[%s1263_s13 + $0x70] sm:$0xff]  ;;  %v298_v19 = vld [vmem:[%s1263_s13 + $0x78] sm:$0xff] }
  0x12   : > { %v301_v20 = vpack.c.bf16 %v288_v17, %v287_v16  ;;  %v306_v21 = vpack.c.bf16 %v298_v19, %v297_v18  ;;  %v289_v22 = vld [vmem:[%s1263_s13 + $0x30] sm:$0xff]  ;;  %v290_v23 = vld [vmem:[%s1263_s13 + $0x38] sm:$0xff]  ;;  %v291_v25 = vld [vmem:[%s1263_s13 + $0x40] sm:$0xff] }
  0x13   : > { %v302_v24 = vpack.c.bf16 %v290_v23, %v289_v22  ;;  %v292_v26 = vld [vmem:[%s1263_s13 + $0x48] sm:$0xff] }
  0x14   : > { %374 = vmatpush.bf16.msra.mxu0 %v1123_v2  ;;  %1136 = vmatpush.bf16.msra.mxu3 %v1123_v2  ;;  %v303_v27 = vpack.c.bf16 %v292_v26, %v291_v25 }
  0x18   : > { %375 = vmatpush.bf16.msra.mxu0 %v1122_v3  ;;  %1137 = vmatpush.bf16.msra.mxu3 %v1122_v3 }
  0x1b   : > { %1080 = vmatmul.msk.bf16.vlgmr.msra.gmra.mxu0 %vm343_vm0, %v299_v8  ;;  %1085 = vmatmul.msk.bf16.vlgmr.msra.gmra.mxu3 %vm343_vm0, %v304_v9 }
  0x2b   : > { %1081 = vmatmul.msk.bf16.gmra.mxu0 %vm343_vm0, %v300_v14  ;;  %1086 = vmatmul.msk.bf16.gmra.mxu3 %vm343_vm0, %v305_v15 }
  0x3b   : > { %1082 = vmatmul.msk.bf16.gmra.mxu0 %vm343_vm0, %v301_v20  ;;  %1087 = vmatmul.msk.bf16.gmra.mxu3 %vm343_vm0, %v306_v21 }
  0x4b   : > { %1083 = vmatmul.msk.bf16.gmra.mxu0 %vm343_vm0, %v302_v24 }
  0x5b   : > { %1084 = vmatmul.msk.bf16.gmra.mxu0 %vm343_vm0, %v303_v27 }
  0x98   : > { %v377_v29 = vpop.f32.mrf.mxu0 }
  0x99   : > { %v378_v30 = vadd.f32 %v1295_v28, %v377_v29 }
  0x9b   : > { %417 = vadd.xlane.f32.xlu1 %v378_v30 }
  0x9e   : > { %v402_v31 = vpop.f32.mrf.mxu3 }
  0x9f   : > { %v403_v32 = vadd.f32 %v1295_v28, %v402_v31 }
  0xa0   : > { %v379_v33 = vpop.f32.mrf.mxu0 }
  0xa1   : > { %v380_v34 = vadd.f32 %v1295_v28, %v379_v33  ;;  %437 = vadd.xlane.f32.xlu2 %v403_v32 }
  0xa3   : > { %419 = vadd.xlane.f32.xlu1 %v380_v34 }
  0xa6   : > { %v404_v35 = vpop.f32.mrf.mxu3 }
  0xa7   : > { %v1301_v36 = vadd.f32 %v1295_v28, %v404_v35 }
  0xa8   : > { %v382_v37 = vpop.f32.mrf.mxu0 }
  0xa9   : > { %439 = vadd.xlane.f32.xlu2 %v1301_v36  ;;  %v383_v55 = vadd.f32 %v1295_v28, %v382_v37 }
  0xae   : > { %v407_v38 = vpop.f32.mrf.mxu3 }
  0xaf   : > { %v1305_v39 = vadd.f32 %v1295_v28, %v407_v38 }
  0xb0   : > { %v384_v40 = vpop.f32.mrf.mxu0 }
  0xb1   : > { %v385_v41 = vadd.f32 %v1295_v28, %v384_v40  ;;  %441 = vadd.xlane.f32.xlu2 %v1305_v39 }
  0xb3   : > { %423 = vadd.xlane.f32.xlu1 %v385_v41 }
  0xb6   : > { %v409_v44 = vpop.f32.mrf.mxu3 }
  0xb7   : > { %v1322_v56 = vadd.f32 %v1295_v28, %v409_v44 }
  0xb8   : > { %v387_v42 = vpop.f32.mrf.mxu0 }
  0xb9   : > { %v388_v43 = vadd.f32 %v1295_v28, %v387_v42 }
  0xbb   : > { %425 = vadd.xlane.f32.xlu1 %v388_v43 }
  0xbe   : > { %v412_v47 = vpop.f32.mrf.mxu3 }
  0xbf   : > { %v1315_v48 = vadd.f32 %v1295_v28, %v412_v47 }
  0xc0   : > { %v389_v45 = vpop.f32.mrf.mxu0 }
  0xc1   : > { %v1311_v46 = vadd.f32 %v1295_v28, %v389_v45 }
  0xc3   : > { %427 = vadd.xlane.f32.xlu2 %v1311_v46 }
  0xc6   : > { %v414_v57 = vpop.f32.mrf.mxu3 }
  0xc7   : > { %v1326_v58 = vadd.f32 %v1295_v28, %v414_v57 }
  0xc8   : > { %v392_v49 = vpop.f32.mrf.mxu0 }
  0xc9   : > { %v1377_v23 = vadd.f32 %v1295_v28, %v392_v49 }
  0xcb   : > { %445 = vadd.xlane.f32.xlu2 %v1315_v48 }
  0xd0   : > { %v394_v50 = vpop.f32.mrf.mxu0 }
  0xd8   : > { %v397_v51 = vpop.f32.mrf.mxu0 }
  0xd9   : > { %v398_v52 = vadd.f32 %v1295_v28, %v397_v51 }
  0xdb   : > { %433 = vadd.xlane.f32.xlu0 %v398_v52 }
  0xe0   : > { %v399_v53 = vpop.f32.mrf.mxu0 }
  0xe1   : > { %v400_v54 = vadd.f32 %v1295_v28, %v399_v53 }
  0xe3   : > { %435 = vadd.xlane.f32.xlu0 %v400_v54 }
  0xeb   : > { %421 = vadd.xlane.f32.xlu0 %v383_v55 }
  0xf3   : > { %443 = vadd.xlane.f32.xlu0 %v1322_v56 }
  0xfb   : > { %447 = vadd.xlane.f32.xlu0 %v1326_v58 }
 0x10e   : > { %v418_v59 = vpop.xlane.xlu1 %417 }
 0x10f   : > { %v1329_v60 = vmul.f32 0.0078125, %v418_v59 }
 0x111   : > { %v1332_v61 = vsub.f32 %v378_v30, %v1329_v60  ;;  %v1389_v30 = vadd.f32 %v1295_v28, %v394_v50  ;;  %v529_v57 = vmul.f32 0.0, %v1329_v60 }
 0x113   : > { %v481_v62 = vmul.f32 %v1332_v61, %v1332_v61  ;;  %v545_v59 = vmul.f32 %v529_v57, %v1329_v60 }
 0x114   : > { %v438_v0 = vpop.xlane.xlu2 %437 }
 0x115   : > { %497 = vadd.xlane.f32.xlu1 %v481_v62  ;;  %v1341_v3 = vmul.f32 0.0078125, %v438_v0  ;;  %v1128_v0 = vld [vmem:[%s1797_s5 + $0x10] sm:$0xff] }
 0x116   : > { %v420_v63 = vpop.xlane.xlu1 %419 }
 0x117   : > { %v1336_v1 = vmul.f32 0.0078125, %v420_v63  ;;  %v1346_v5 = vsub.f32 %v403_v32, %v1341_v3 }
 0x119   : > { %v1339_v2 = vsub.f32 %v380_v34, %v1336_v1  ;;  %v491_v6 = vmul.f32 %v1346_v5, %v1346_v5 }
 0x11b   : > { %v482_v4 = vmul.f32 %v1339_v2, %v1339_v2 }
 0x11c   : > { %v440_v19 = vpop.xlane.xlu2 %439 }
 0x11d   : > { %499 = vadd.xlane.f32.xlu2 %v482_v4  ;;  %v1379_v24 = vmul.f32 0.0078125, %v440_v19 }
 0x11f   : > { %v1386_v29 = vsub.f32 %v1301_v36, %v1379_v24 }
 0x121   : > { %v492_v33 = vmul.f32 %v1386_v29, %v1386_v29 }
 0x124   : > { %v442_v26 = vpop.xlane.xlu2 %441 }
 0x125   : > { %517 = vadd.xlane.f32.xlu2 %v491_v6  ;;  %v1391_v31 = vmul.f32 0.0078125, %v442_v26  ;;  %v530_v6 = vmul.f32 0.0, %v1336_v1 }
 0x126   : > { %v424_v7 = vpop.xlane.xlu1 %423 }
 0x127   : > { %v1350_v8 = vmul.f32 0.0078125, %v424_v7  ;;  %v1400_v35 = vsub.f32 %v1305_v39, %v1391_v31  ;;  %v546_v60 = vmul.f32 %v530_v6, %v1336_v1 }
 0x129   : > { %v1353_v9 = vsub.f32 %v385_v41, %v1350_v8  ;;  %v493_v40 = vmul.f32 %v1400_v35, %v1400_v35  ;;  %v532_v6 = vmul.f32 0.0, %v1350_v8 }
 0x12b   : > { %v484_v10 = vmul.f32 %v1353_v9, %v1353_v9 }
 0x12d   : > { %503 = vadd.xlane.f32.xlu2 %v484_v10  ;;  %v1127_v10 = vld [vmem:[%s1797_s5 + $0x8] sm:$0xff] }
 0x12e   : > { %v426_v11 = vpop.xlane.xlu1 %425 }
 0x12f   : > { %v1357_v12 = vmul.f32 0.0078125, %v426_v11 }
 0x131   : > { %v1360_v13 = vsub.f32 %v388_v43, %v1357_v12 }
 0x133   : > { %v485_v14 = vmul.f32 %v1360_v13, %v1360_v13 }
 0x135   : > { %505 = vadd.xlane.f32.xlu2 %v485_v14 }
 0x136   : > { %v428_v28 = vpop.xlane.xlu2 %427 }
 0x137   : > { %v1405_v37 = vmul.f32 0.0078125, %v428_v28 }
 0x139   : > { %v1417_v39 = vsub.f32 %v1311_v46, %v1405_v37 }
 0x13b   : > { %v486_v50 = vmul.f32 %v1417_v39, %v1417_v39 }
 0x13e   : > { %v446_v45 = vpop.xlane.xlu2 %445 }
 0x13f   : > { %v1427_v49 = vmul.f32 0.0078125, %v446_v45 }
 0x141   : > { %v1440_v53 = vsub.f32 %v1315_v48, %v1427_v49  ;;  %v1130_v48 = vld [vmem:[%s1797_s5 + $0x20] sm:$0xff] }
 0x14e   : > { %v434_v15 = vpop.xlane.xlu0 %433 }
 0x14f   : > { %v1364_v16 = vmul.f32 0.0078125, %v434_v15 }
 0x151   : > { %v1367_v17 = vsub.f32 %v398_v52, %v1364_v16  ;;  %v1133_v52 = vld [vmem:[%s1797_s5 + $0x38] sm:$0xff] }
 0x152   : > { %933 = vmatpush.bf16.msra.mxu1 %v1133_v52  ;;  %1138 = vmatpush.bf16.msra.mxu2 %v1133_v52 }
 0x153   : > { %v489_v18 = vmul.f32 %v1367_v17, %v1367_v17 }
 0x155   : > { %513 = vadd.xlane.f32.xlu0 %v489_v18  ;;  %v1126_v18 = vld [vmem:[%s1797_s5] sm:$0xff] }
 0x156   : > { %v436_v20 = vpop.xlane.xlu0 %435 }
 0x157   : > { %v1371_v21 = vmul.f32 0.0078125, %v436_v20 }
 0x159   : > { %v1374_v22 = vsub.f32 %v400_v54, %v1371_v21  ;;  %v1132_v54 = vld [vmem:[%s1797_s5 + $0x30] sm:$0xff] }
 0x15a   : > { %934 = vmatpush.bf16.msra.mxu1 %v1132_v54  ;;  %1139 = vmatpush.bf16.msra.mxu2 %v1132_v54 }
 0x15b   : > { %v490_v25 = vmul.f32 %v1374_v22, %v1374_v22 }
 0x15d   : > { %429 = vadd.xlane.f32.xlu0 %v1377_v23  ;;  %515 = vadd.xlane.f32.xlu1 %v490_v25 }
 0x15e   : > { %v422_v27 = vpop.xlane.xlu0 %421 }
 0x15f   : > { %v1393_v32 = vmul.f32 0.0078125, %v422_v27 }
 0x161   : > { %v1403_v36 = vsub.f32 %v383_v55, %v1393_v32  ;;  %v495_v55 = vmul.f32 %v1440_v53, %v1440_v53 }
 0x163   : > { %v483_v41 = vmul.f32 %v1403_v36, %v1403_v36 }
 0x165   : > { %519 = vadd.xlane.f32.xlu0 %v492_v33  ;;  %431 = vadd.xlane.f32.xlu1 %v1389_v30 }
 0x166   : > { %v444_v34 = vpop.xlane.xlu0 %443 }
 0x167   : > { %v1407_v38 = vmul.f32 0.0078125, %v444_v34 }
 0x169   : > { %v1421_v44 = vsub.f32 %v1322_v56, %v1407_v38  ;;  %v1131_v56 = vld [vmem:[%s1797_s5 + $0x28] sm:$0xff] }
 0x16a   : > { %935 = vmatpush.bf16.msra.mxu1 %v1131_v56  ;;  %1140 = vmatpush.bf16.msra.mxu2 %v1131_v56  ;;  %v1479_v56 = vld [vmem:[%s1796_s4] ss:$0 sm:$0xff] }
 0x16b   : > { %v494_v51 = vmul.f32 %v1421_v44, %v1421_v44 }
 0x16d   : > { %521 = vadd.xlane.f32.xlu0 %v493_v40  ;;  %501 = vadd.xlane.f32.xlu1 %v483_v41 }
 0x16e   : > { %v448_v42 = vpop.xlane.xlu0 %447  ;;  %936 = vmatpush.bf16.msra.mxu1 %v1130_v48  ;;  %1141 = vmatpush.bf16.msra.mxu2 %v1130_v48 }
 0x16f   : > { %v1413_v43 = vmul.f32 0.0078125, %v448_v42 }
 0x171   : > { %v1425_v47 = vsub.f32 %v1326_v58, %v1413_v43  ;;  %v1129_v58 = vld [vmem:[%s1797_s5 + $0x18] sm:$0xff] }
 0x172   : > { %937 = vmatpush.bf16.msra.mxu1 %v1129_v58  ;;  %1142 = vmatpush.bf16.msra.mxu2 %v1129_v58 }
 0x173   : > { %v496_v46 = vmul.f32 %v1425_v47, %v1425_v47 }
 0x175   : > { %507 = vadd.xlane.f32.xlu0 %v486_v50  ;;  %523 = vadd.xlane.f32.xlu1 %v494_v51 }
 0x176   : > { %527 = vadd.xlane.f32.xlu2 %v496_v46  ;;  %938 = vmatpush.bf16.msra.mxu1 %v1128_v0  ;;  %v1473_v46 = vld [vmem:[%s1795_s3] ss:$0 sm:$0xff] }
 0x177   : > { %1143 = vmatpush.bf16.msra.mxu2 %v1128_v0 }
 0x17a   : > { %939 = vmatpush.bf16.msra.mxu1 %v1127_v10 }
 0x17b   : > { %1144 = vmatpush.bf16.msra.mxu2 %v1127_v10 }
 0x17d   : > { %525 = vadd.xlane.f32.xlu1 %v495_v55 }
 0x17e   : > { %940 = vmatpush.bf16.msra.mxu1 %v1126_v18 }
 0x17f   : > { %1145 = vmatpush.bf16.msra.mxu2 %v1126_v18 }
 0x188   : > { %v498_v62 = vpop.xlane.xlu1 %497 }
 0x189   : > { %v561_v63 = vsub.f32 %v498_v62, %v545_v59 }
 0x18b   : > { %v577_v4 = vmul.f32 0.0078125, %v561_v63 }
 0x18d   : > { %v593_v7 = vmax.f32 %v577_v4, 0.0 }
 0x18f   : > { %v609_v11 = vadd.f32 1e-05, %v593_v7  ;;  %v539_v7 = vmul.f32 0.0, %v1341_v3 }
 0x190   : > { %v500_v14 = vpop.xlane.xlu2 %499 }
 0x191   : > { %1158 = vrsqrt.f32 %v609_v11  ;;  %v562_v15 = vsub.f32 %v500_v14, %v546_v60  ;;  %vm631_vm2 = vweird.f32 %v609_v11 }
 0x193   : > { %v578_v19 = vmul.f32 0.0078125, %v562_v15  ;;  %v537_v15 = vmul.f32 0.0, %v1364_v16 }
 0x195   : > { %v594_v20 = vmax.f32 %v578_v19, 0.0  ;;  %v533_v19 = vmul.f32 0.0, %v1357_v12 }
 0x197   : > { %v1159_v25 = vpop.eup %1158  ;;  %v610_v26 = vadd.f32 1e-05, %v594_v20 }
 0x198   : > { %v626_v27 = vmul.f32 %v1159_v25, %v609_v11  ;;  %vm632_vm1 = vweird.f32 %v1159_v25  ;;  %v518_v0 = vpop.xlane.xlu2 %517  ;;  %v548_v11 = vmul.f32 %v532_v6, %v1350_v8 }
 0x199   : > { %1160 = vrsqrt.f32 %v610_v26  ;;  %vm633_vm3 = vmor %vm631_vm2, %vm632_vm1  ;;  %vm641_vm5 = vweird.f32 %v610_v26 }
 0x19a   : > { %v627_v33 = vmul.f32 %v1159_v25, %v626_v27 }
 0x19c   : > { %v628_v34 = vmul.f32 0.5, %v627_v33  ;;  %v549_v33 = vmul.f32 %v533_v19, %v1357_v12  ;;  %v541_v19 = vmul.f32 0.0, %v1391_v31 }
 0x19e   : > { %v629_v1 = vsub.f32 1.5, %v628_v34 }
 0x19f   : > { %v1161_v28 = vpop.eup %1160 }
 0x1a0   : > { %v630_v40 = vmul.f32 %v1159_v25, %v629_v1  ;;  %v636_v41 = vmul.f32 %v1161_v28, %v610_v26  ;;  %vm642_vm4 = vweird.f32 %v1161_v28  ;;  %v504_v10 = vpop.xlane.xlu2 %503  ;;  %v553_v26 = vmul.f32 %v537_v15, %v1364_v16 }
 0x1a1   : > { %vm643_vm6 = vmor %vm641_vm5, %vm642_vm4  ;;  %v564_v60 = vsub.f32 %v504_v10, %v548_v11 }
 0x1a2   : > { %v637_v42 = vmul.f32 %v1161_v28, %v636_v41  ;;  %v634_v45 = vsel %vm633_vm3, %v1159_v25, %v630_v40 }
 0x1a3   : > { %v785_v51 = vmul.f32 %v634_v45, %v1332_v61  ;;  %v580_v18 = vmul.f32 0.0078125, %v564_v60 }
 0x1a4   : > { %v638_v50 = vmul.f32 0.5, %v637_v42 }
 0x1a5   : > { %v805_v55 = vmul.f32 %v1473_v46, %v785_v51  ;;  %v596_v27 = vmax.f32 %v580_v18, 0.0 }
 0x1a6   : > { %v639_v52 = vsub.f32 1.5, %v638_v50 }
 0x1a7   : > { %v825_v58 = vadd.f32 %v1479_v56, %v805_v55  ;;  %v1494_v41 = vadd.f32 1e-05, %v596_v27 }
 0x1a8   : > { %v640_v54 = vmul.f32 %v1161_v28, %v639_v52  ;;  %v506_v25 = vpop.xlane.xlu2 %505 }
 0x1a9   : > { %v841_v62 = vmax.f32 %v825_v58, 0.0  ;;  %1162 = vrsqrt.f32 %v1494_v41  ;;  %v540_v58 = vmul.f32 0.0, %v1379_v24  ;;  %vm661_vm0 = vweird.f32 %v1494_v41 }
 0x1aa   : > { %v644_v48 = vsel %vm643_vm6, %v1161_v28, %v640_v54  ;;  %v565_v28 = vsub.f32 %v506_v25, %v549_v33 }
 0x1ab   : > { %v786_v61 = vmul.f32 %v644_v48, %v1339_v2  ;;  %v555_v2 = vmul.f32 %v539_v7, %v1341_v3  ;;  %v538_v3 = vmul.f32 0.0, %v1371_v21  ;;  %v556_v6 = vmul.f32 %v540_v58, %v1379_v24 }
 0x1ac   : > { %v581_v45 = vmul.f32 0.0078125, %v565_v28  ;;  %v534_v28 = vmul.f32 0.0, %v1405_v37 }
 0x1ad   : > { %v806_v57 = vmul.f32 %v1473_v46, %v786_v61  ;;  %v571_v14 = vsub.f32 %v518_v0, %v555_v2  ;;  %v554_v16 = vmul.f32 %v538_v3, %v1371_v21 }
 0x1ae   : > { %v597_v48 = vmax.f32 %v581_v45, 0.0 }
 0x1af   : > { %v826_v59 = vadd.f32 %v1479_v56, %v806_v57  ;;  %v587_v20 = vmul.f32 0.0078125, %v571_v14 }
 0x1b1   : > { %v842_v63 = vmax.f32 %v826_v59, 0.0  ;;  %v603_v8 = vmax.f32 %v587_v20, 0.0  ;;  %v531_v20 = vmul.f32 0.0, %v1393_v32 }
 0x1b3   : > { %v857_v4 = vpack.c.bf16 %v842_v63, %v841_v62  ;;  %v1496_v50 = vadd.f32 1e-05, %v603_v8  ;;  %v1513_v62 = vpop.eup %1162  ;;  %v1515_v63 = vadd.f32 1e-05, %v597_v48  ;;  %v547_v3 = vmul.f32 %v531_v20, %v1393_v32 }
 0x1b4   : > { %v656_v14 = vmul.f32 %v1513_v62, %v1494_v41  ;;  %v544_v48 = vmul.f32 0.0, %v1413_v43  ;;  %vm662_vm13 = vweird.f32 %v1513_v62 }
 0x1b5   : > { %941 = vmatmul.bf16.vlgmr.msra.gmra.mxu1 %v857_v4  ;;  %vm731_vm10 = vweird.f32 %v1496_v50  ;;  %vm1605_vm1 = vmor %vm661_vm0, %vm662_vm13 }
 0x1c8   : > { %v514_v34 = vpop.xlane.xlu0 %513 }
 0x1c9   : > { %v569_v1 = vsub.f32 %v514_v34, %v553_v26  ;;  %v657_v34 = vmul.f32 %v1513_v62, %v656_v14  ;;  %v550_v14 = vmul.f32 %v534_v28, %v1405_v37 }
 0x1cb   : > { %v585_v40 = vmul.f32 0.0078125, %v569_v1  ;;  %v658_v58 = vmul.f32 0.5, %v657_v34 }
 0x1cd   : > { %v601_v42 = vmax.f32 %v585_v40, 0.0  ;;  %v557_v40 = vmul.f32 %v541_v19, %v1391_v31 }
 0x1cf   : > { %v1498_v51 = vadd.f32 1e-05, %v601_v42  ;;  %v542_v42 = vmul.f32 0.0, %v1407_v38 }
 0x1d0   : > { %v430_v12 = vpop.xlane.xlu0 %429  ;;  %v516_v52 = vpop.xlane.xlu1 %515 }
 0x1d1   : > { %1164 = vrsqrt.f32 %v1498_v51  ;;  %v1503_v54 = vmul.f32 0.0078125, %v430_v12  ;;  %v570_v55 = vsub.f32 %v516_v52, %v554_v16  ;;  %vm711_vm8 = vweird.f32 %v1498_v51 }
 0x1d2   : > { %1166 = vrsqrt.f32 %v1496_v50 }
 0x1d3   : > { %v586_v61 = vmul.f32 0.0078125, %v570_v55  ;;  %v1508_v57 = vsub.f32 %v1377_v23, %v1503_v54 }
 0x1d5   : > { %v602_v21 = vmax.f32 %v586_v61, 0.0  ;;  %v487_v59 = vmul.f32 %v1508_v57, %v1508_v57 }
 0x1d7   : > { %v1517_v0 = vpop.eup %1164  ;;  %v1519_v4 = vadd.f32 1e-05, %v602_v21  ;;  %509 = vadd.xlane.f32.xlu0 %v487_v59 }
 0x1d8   : > { %v706_v23 = vmul.f32 %v1517_v0, %v1498_v51  ;;  %v520_v7 = vpop.xlane.xlu0 %519  ;;  %v432_v10 = vpop.xlane.xlu1 %431  ;;  %vm712_vm7 = vweird.f32 %v1517_v0  ;;  %v560_v51 = vmul.f32 %v544_v48, %v1413_v43 }
 0x1d9   : > { %v1524_v11 = vpop.eup %1166  ;;  %1168 = vrsqrt.f32 %v1519_v4  ;;  %v572_v2 = vsub.f32 %v520_v7, %v556_v6  ;;  %v1527_v60 = vmul.f32 0.0078125, %v432_v10  ;;  %vm1567_vm9 = vmor %vm711_vm8, %vm712_vm7  ;;  %vm721_vm14 = vweird.f32 %v1519_v4 }
 0x1da   : > { %1170 = vrsqrt.f32 %v1515_v63  ;;  %v707_v15 = vmul.f32 %v1517_v0, %v706_v23  ;;  %v726_v25 = vmul.f32 %v1524_v11, %v1496_v50  ;;  %vm732_vm11 = vweird.f32 %v1524_v11 }
 0x1db   : > { %v588_v24 = vmul.f32 0.0078125, %v572_v2  ;;  %v1535_v18 = vsub.f32 %v1389_v30, %v1527_v60  ;;  %vm1622_vm2 = vmor %vm731_vm10, %vm732_vm11  ;;  %vm671_vm7 = vweird.f32 %v1515_v63 }
 0x1dc   : > { %v708_v26 = vmul.f32 0.5, %v707_v15  ;;  %v727_v16 = vmul.f32 %v1524_v11, %v726_v25  ;;  %v558_v15 = vmul.f32 %v542_v42, %v1407_v38  ;;  %v659_v25 = vsub.f32 1.5, %v658_v58 }
 0x1dd   : > { %v604_v27 = vmax.f32 %v588_v24, 0.0  ;;  %v488_v33 = vmul.f32 %v1535_v18, %v1535_v18 }
 0x1de   : > { %v709_v1 = vsub.f32 1.5, %v708_v26  ;;  %v728_v7 = vmul.f32 0.5, %v727_v16  ;;  %v660_v48 = vmul.f32 %v1513_v62, %v659_v25 }
 0x1df   : > { %v1545_v8 = vpop.eup %1168  ;;  %v1547_v30 = vadd.f32 1e-05, %v604_v27  ;;  %511 = vadd.xlane.f32.xlu1 %v488_v33  ;;  %v543_v27 = vmul.f32 0.0, %v1427_v49 }
 0x1e0   : > { %v1552_v45 = vpop.eup %1170  ;;  %v716_v12 = vmul.f32 %v1545_v8, %v1519_v4  ;;  %v522_v52 = vpop.xlane.xlu0 %521  ;;  %v710_v61 = vmul.f32 %v1517_v0, %v709_v1  ;;  %vm722_vm12 = vweird.f32 %v1545_v8  ;;  %v729_v43 = vsub.f32 1.5, %v728_v7 }
 0x1e1   : > { %v502_v55 = vpop.xlane.xlu1 %501  ;;  %1172 = vrsqrt.f32 %v1547_v30  ;;  %v573_v31 = vsub.f32 %v522_v52, %v557_v40  ;;  %v666_v59 = vmul.f32 %v1552_v45, %v1515_v63  ;;  %vm723_vm15 = vmor %vm721_vm14, %vm722_vm12  ;;  %v664_v41 = vsel %vm1605_vm1, %v1513_v62, %v660_v48 }
 0x1e2   : > { %v563_v32 = vsub.f32 %v502_v55, %v547_v3  ;;  %v717_v21 = vmul.f32 %v1545_v8, %v716_v12  ;;  %v714_v20 = vsel %vm1567_vm9, %v1517_v0, %v710_v61  ;;  %vm741_vm4 = vweird.f32 %v1547_v30 }
 0x1e3   : > { %v589_v6 = vmul.f32 0.0078125, %v573_v31  ;;  %v667_v37 = vmul.f32 %v1552_v45, %v666_v59  ;;  %v793_v3 = vmul.f32 %v714_v20, %v1367_v17  ;;  %v730_v59 = vmul.f32 %v1524_v11, %v729_v43 }
 0x1e4   : > { %v579_v23 = vmul.f32 0.0078125, %v563_v32  ;;  %v718_v2 = vmul.f32 0.5, %v717_v21  ;;  %v788_v43 = vmul.f32 %v664_v41, %v1353_v9  ;;  %vm672_vm5 = vweird.f32 %v1552_v45 }
 0x1e5   : > { %v605_v24 = vmax.f32 %v589_v6, 0.0  ;;  %v668_v61 = vmul.f32 0.5, %v667_v37  ;;  %v813_v21 = vmul.f32 %v1473_v46, %v793_v3  ;;  %v734_v50 = vsel %vm1622_vm2, %v1524_v11, %v730_v59  ;;  %vm1660_vm8 = vmor %vm671_vm7, %vm672_vm5 }
 0x1e6   : > { %v595_v19 = vmax.f32 %v579_v23, 0.0  ;;  %v719_v26 = vsub.f32 1.5, %v718_v2  ;;  %v795_v48 = vmul.f32 %v734_v50, %v1346_v5 }
 0x1e7   : > { %v1580_v33 = vpop.eup %1172  ;;  %v1584_v38 = vadd.f32 1e-05, %v605_v24  ;;  %v833_v25 = vadd.f32 %v1479_v56, %v813_v21 }
 0x1e8   : > { %v1586_v34 = vadd.f32 1e-05, %v595_v19  ;;  %v720_v1 = vmul.f32 %v1545_v8, %v719_v26  ;;  %v736_v0 = vmul.f32 %v1580_v33, %v1547_v30  ;;  %v508_v28 = vpop.xlane.xlu0 %507  ;;  %vm742_vm3 = vweird.f32 %v1580_v33 }
 0x1e9   : > { %v524_v40 = vpop.xlane.xlu1 %523  ;;  %1174 = vrsqrt.f32 %v1584_v38  ;;  %v566_v42 = vsub.f32 %v508_v28, %v550_v14  ;;  %v528_v16 = vpop.xlane.xlu2 %527  ;;  %vm1641_vm6 = vmor %vm741_vm4, %vm742_vm3  ;;  %v849_v30 = vmax.f32 %v833_v25, 0.0  ;;  %vm751_vm2 = vweird.f32 %v1584_v38 }
 0x1ea   : > { %v737_v12 = vmul.f32 %v1580_v33, %v736_v0  ;;  %1176 = vrsqrt.f32 %v1586_v34  ;;  %v576_v52 = vsub.f32 %v528_v16, %v560_v51  ;;  %v574_v55 = vsub.f32 %v524_v40, %v558_v15 }
 0x1eb   : > { %v582_v31 = vmul.f32 0.0078125, %v566_v42  ;;  %v724_v17 = vsel %vm723_vm15, %v1545_v8, %v720_v1  ;;  %v669_v51 = vsub.f32 1.5, %v668_v61  ;;  %vm651_vm10 = vweird.f32 %v1586_v34 }
 0x1ec   : > { %v738_v32 = vmul.f32 0.5, %v737_v12  ;;  %v590_v58 = vmul.f32 0.0078125, %v574_v55  ;;  %v794_v4 = vmul.f32 %v724_v17, %v1374_v22  ;;  %v592_v23 = vmul.f32 0.0078125, %v576_v52 }
 0x1ed   : > { %v598_v6 = vmax.f32 %v582_v31, 0.0  ;;  %v559_v22 = vmul.f32 %v543_v27, %v1427_v49  ;;  %v670_v11 = vmul.f32 %v1552_v45, %v669_v51  ;;  %v808_v55 = vmul.f32 %v1473_v46, %v788_v43 }
 0x1ee   : > { %v739_v10 = vsub.f32 1.5, %v738_v32  ;;  %v606_v8 = vmax.f32 %v590_v58, 0.0  ;;  %v814_v15 = vmul.f32 %v1473_v46, %v794_v4  ;;  %v608_v62 = vmax.f32 %v592_v23, 0.0 }
 0x1ef   : > { %v1609_v2 = vpop.eup %1174  ;;  %v1611_v14 = vadd.f32 1e-05, %v598_v6  ;;  %v674_v5 = vsel %vm1660_vm8, %v1552_v45, %v670_v11  ;;  %v815_v23 = vmul.f32 %v1473_v46, %v795_v48 }
 0x1f0   : > { %v1177_v24 = vpop.eup %1176  ;;  %v740_v20 = vmul.f32 %v1580_v33, %v739_v10  ;;  %v746_v27 = vmul.f32 %v1609_v2, %v1584_v38  ;;  %v1637_v37 = vadd.f32 1e-05, %v606_v8  ;;  %v834_v40 = vadd.f32 %v1479_v56, %v814_v15 }
 0x1f1   : > { %v526_v49 = vpop.xlane.xlu1 %525  ;;  %v646_v26 = vmul.f32 %v1177_v24, %v1586_v34  ;;  %1178 = vrsqrt.f32 %v1611_v14  ;;  %v1651_v42 = vadd.f32 1e-05, %v608_v62  ;;  %vm652_vm9 = vweird.f32 %v1177_v24 }
 0x1f2   : > { %v575_v28 = vsub.f32 %v526_v49, %v559_v22  ;;  %1180 = vrsqrt.f32 %v1637_v37  ;;  %v744_v3 = vsel %vm1641_vm6, %v1580_v33, %v740_v20  ;;  %v850_v12 = vmax.f32 %v834_v40, 0.0  ;;  %vm653_vm11 = vmor %vm651_vm10, %vm652_vm9 }
 0x1f3   : > { %v647_v0 = vmul.f32 %v1177_v24, %v646_v26  ;;  %v747_v52 = vmul.f32 %v1609_v2, %v746_v27  ;;  %v796_v58 = vmul.f32 %v744_v3, %v1386_v29  ;;  %1182 = vrsqrt.f32 %v1651_v42 }
 0x1f4   : > { %v591_v16 = vmul.f32 0.0078125, %v575_v28  ;;  %v861_v32 = vpack.c.bf16 %v850_v12, %v849_v30  ;;  %v828_v10 = vadd.f32 %v1479_v56, %v808_v55  ;;  %v789_v45 = vmul.f32 %v674_v5, %v1360_v13 }
 0x1f5   : > { %v648_v9 = vmul.f32 0.5, %v647_v0  ;;  %v748_v59 = vmul.f32 0.5, %v747_v52  ;;  %v816_v8 = vmul.f32 %v1473_v46, %v796_v58  ;;  %v835_v20 = vadd.f32 %v1479_v56, %v815_v23 }
 0x1f6   : > { %v607_v17 = vmax.f32 %v591_v16, 0.0  ;;  %961 = vmatmul.bf16.vlgmr.msra.gmra.mxu2 %v861_v32  ;;  %v844_v62 = vmax.f32 %v828_v10, 0.0  ;;  %vm752_vm13 = vweird.f32 %v1609_v2  ;;  %vm681_vm14 = vweird.f32 %v1611_v14 }
 0x1f7   : > { %v1179_v61 = vpop.eup %1178  ;;  %v649_v31 = vsub.f32 1.5, %v648_v9  ;;  %v749_v34 = vsub.f32 1.5, %v748_v59  ;;  %v836_v50 = vadd.f32 %v1479_v56, %v816_v8  ;;  %v809_v13 = vmul.f32 %v1473_v46, %v789_v45  ;;  %vm753_vm4 = vmor %vm751_vm2, %vm752_vm13 }
 0x1f8   : > { %v676_v63 = vmul.f32 %v1179_v61, %v1611_v14  ;;  %v1666_v21 = vadd.f32 1e-05, %v607_v17  ;;  %v1181_v29 = vpop.eup %1180  ;;  %vm682_vm12 = vweird.f32 %v1179_v61  ;;  %vm761_vm0 = vweird.f32 %v1637_v37 }
 0x1f9   : > { %v650_v4 = vmul.f32 %v1177_v24, %v649_v31  ;;  %v756_v7 = vmul.f32 %v1181_v29, %v1637_v37  ;;  %v1680_v49 = vpop.eup %1182  ;;  %vm683_vm15 = vmor %vm681_vm14, %vm682_vm12  ;;  %vm762_vm1 = vweird.f32 %v1181_v29  ;;  %v750_v1 = vmul.f32 %v1609_v2, %v749_v34 }
 0x1fa   : > { %v677_v6 = vmul.f32 %v1179_v61, %v676_v63  ;;  %1184 = vrsqrt.f32 %v1666_v21  ;;  %v776_v0 = vmul.f32 %v1680_v49, %v1651_v42  ;;  %v852_v30 = vmax.f32 %v836_v50, 0.0  ;;  %vm763_vm3 = vmor %vm761_vm0, %vm762_vm1 }
 0x1fb   : > { %v654_v15 = vsel %vm653_vm11, %v1177_v24, %v650_v4  ;;  %v757_v41 = vmul.f32 %v1181_v29, %v756_v7  ;;  %v851_v9 = vmax.f32 %v835_v20, 0.0  ;;  %v829_v52 = vadd.f32 %v1479_v56, %v809_v13 }
 0x1fc   : > { %v678_v22 = vmul.f32 0.5, %v677_v6  ;;  %v787_v19 = vmul.f32 %v654_v15, %v1403_v36  ;;  %v777_v48 = vmul.f32 %v1680_v49, %v776_v0  ;;  %vm782_vm6 = vweird.f32 %v1680_v49 }
 0x1fd   : > { %v758_v25 = vmul.f32 0.5, %v757_v41  ;;  %v845_v32 = vmax.f32 %v829_v52, 0.0  ;;  %vm771_vm7 = vweird.f32 %v1666_v21  ;;  %vm781_vm9 = vweird.f32 %v1651_v42 }
 0x1fe   : > { %v679_v51 = vsub.f32 1.5, %v678_v22  ;;  %v807_v26 = vmul.f32 %v1473_v46, %v787_v19  ;;  %v778_v63 = vmul.f32 0.5, %v777_v48  ;;  %vm783_vm10 = vmor %vm781_vm9, %vm782_vm6  ;;  %vm982_vm11 = vcmask 130048  }
 0x1ff   : > { %v759_v27 = vsub.f32 1.5, %v758_v25  ;;  %v535_v50 = vmul.f32 0.0, %v1503_v54 }
 0x200   : > { %v680_v24 = vmul.f32 %v1179_v61, %v679_v51  ;;  %v1185_v36 = vpop.eup %1184  ;;  %v827_v43 = vadd.f32 %v1479_v56, %v807_v26 }
 0x201   : > { %v766_v28 = vmul.f32 %v1185_v36, %v1666_v21  ;;  %v760_v11 = vmul.f32 %v1181_v29, %v759_v27  ;;  %vm772_vm5 = vweird.f32 %v1185_v36 }
 0x202   : > { %v684_v40 = vsel %vm683_vm15, %v1179_v61, %v680_v24  ;;  %v843_v14 = vmax.f32 %v827_v43, 0.0  ;;  %v754_v61 = vsel %vm753_vm4, %v1609_v2, %v750_v1  ;;  %v779_v2 = vsub.f32 1.5, %v778_v63  ;;  %vm773_vm8 = vmor %vm771_vm7, %vm772_vm5 }
 0x203   : > { %v790_v3 = vmul.f32 %v684_v40, %v1417_v39  ;;  %v767_v37 = vmul.f32 %v1185_v36, %v766_v28  ;;  %v764_v55 = vsel %vm763_vm3, %v1181_v29, %v760_v11  ;;  %v862_v39 = vpack.c.bf16 %v852_v30, %v851_v9 }
 0x204   : > { %v858_v16 = vpack.c.bf16 %v844_v62, %v843_v14  ;;  %v798_v31 = vmul.f32 %v764_v55, %v1421_v44  ;;  %v797_v33 = vmul.f32 %v754_v61, %v1400_v35  ;;  %v780_v7 = vmul.f32 %v1680_v49, %v779_v2 }
 0x205   : > { %v810_v12 = vmul.f32 %v1473_v46, %v790_v3  ;;  %v768_v17 = vmul.f32 0.5, %v767_v37  ;;  %v551_v24 = vmul.f32 %v535_v50, %v1503_v54  ;;  %v536_v43 = vmul.f32 0.0, %v1527_v60 }
 0x206   : > { %946 = vmatmul.bf16.gmra.mxu1 %v858_v16  ;;  %966 = vmatmul.bf16.gmra.mxu2 %v862_v39  ;;  %v818_v5 = vmul.f32 %v1473_v46, %v798_v31  ;;  %v817_v59 = vmul.f32 %v1473_v46, %v797_v33  ;;  %v784_v22 = vsel %vm783_vm10, %v1680_v49, %v780_v7  ;;  %v1722_v49 = vld [vmem:[%s1798_s6] ss:$0 sm:$0xff] }
 0x207   : > { %v830_v38 = vadd.f32 %v1479_v56, %v810_v12  ;;  %v769_v29 = vsub.f32 1.5, %v768_v17  ;;  %v800_v41 = vmul.f32 %v784_v22, %v1425_v47  ;;  %v552_v28 = vmul.f32 %v536_v43, %v1527_v60 }
 0x208   : > { %v838_v6 = vadd.f32 %v1479_v56, %v818_v5  ;;  %v837_v44 = vadd.f32 %v1479_v56, %v817_v59 }
 0x209   : > { %v846_v58 = vmax.f32 %v830_v38, 0.0  ;;  %v770_v23 = vmul.f32 %v1185_v36, %v769_v29  ;;  %v820_v21 = vmul.f32 %v1473_v46, %v800_v41 }
 0x20a   : > { %v854_v35 = vmax.f32 %v838_v6, 0.0  ;;  %v853_v8 = vmax.f32 %v837_v44, 0.0 }
 0x20b   : > { %v859_v4 = vpack.c.bf16 %v846_v58, %v845_v32  ;;  %v774_v10 = vsel %vm773_vm8, %v1185_v36, %v770_v23  ;;  %v840_v42 = vadd.f32 %v1479_v56, %v820_v21 }
 0x20c   : > { %v863_v15 = vpack.c.bf16 %v854_v35, %v853_v8  ;;  %v799_v45 = vmul.f32 %v774_v10, %v1440_v53 }
 0x20d   : > { %v856_v20 = vmax.f32 %v840_v42, 0.0 }
 0x20e   : > { %v819_v19 = vmul.f32 %v1473_v46, %v799_v45 }
 0x210   : > { %v839_v34 = vadd.f32 %v1479_v56, %v819_v19 }
 0x212   : > { %v855_v51 = vmax.f32 %v839_v34, 0.0 }
 0x214   : > { %v864_v25 = vpack.c.bf16 %v856_v20, %v855_v51 }
 0x216   : > { %951 = vmatmul.bf16.gmra.mxu1 %v859_v4  ;;  %971 = vmatmul.bf16.gmra.mxu2 %v863_v15 }
 0x226   : > { %976 = vmatmul.bf16.gmra.mxu2 %v864_v25 }
 0x232   : > { %v942_v47 = vpop.f32.mrf.mxu1 }
 0x233   : > { %v943_v53 = vadd.f32 %v1722_v49, %v942_v47 }
 0x235   : > { %983 = vst.msk [vmem:[%s1729_s22] sm:$0xff] %vm982_vm11, %v943_v53 }
 0x23a   : > { %v944_v26 = vpop.f32.mrf.mxu1 }
 0x23b   : > { %v945_v62 = vadd.f32 %v1722_v49, %v944_v26 }
 0x23d   : > { %984 = vst.msk [vmem:[%s1729_s22 + $0x8] sm:$0xff] %vm982_vm11, %v945_v62 }
 0x24a   : > { %v510_v13 = vpop.xlane.xlu0 %509 }
 0x24b   : > { %v567_v36 = vsub.f32 %v510_v13, %v551_v24 }
 0x24d   : > { %v583_v27 = vmul.f32 0.0078125, %v567_v36 }
 0x24f   : > { %v599_v1 = vmax.f32 %v583_v27, 0.0 }
 0x251   : > { %v615_v0 = vadd.f32 1e-05, %v599_v1 }
 0x252   : > { %v512_v40 = vpop.xlane.xlu1 %511 }
 0x253   : > { %1186 = vrsqrt.f32 %v615_v0  ;;  %v568_v11 = vsub.f32 %v512_v40, %v552_v28  ;;  %vm691_vm13 = vweird.f32 %v615_v0 }
 0x255   : > { %v584_v14 = vmul.f32 0.0078125, %v568_v11 }
 0x257   : > { %v600_v30 = vmax.f32 %v584_v14, 0.0 }
 0x259   : > { %v1187_v3 = vpop.eup %1186  ;;  %v616_v37 = vadd.f32 1e-05, %v600_v30 }
 0x25a   : > { %v686_v9 = vmul.f32 %v1187_v3, %v615_v0  ;;  %vm692_vm12 = vweird.f32 %v1187_v3 }
 0x25b   : > { %1188 = vrsqrt.f32 %v616_v37  ;;  %vm693_vm14 = vmor %vm691_vm13, %vm692_vm12  ;;  %vm701_vm0 = vweird.f32 %v616_v37 }
 0x25c   : > { %v687_v16 = vmul.f32 %v1187_v3, %v686_v9 }
 0x25e   : > { %v688_v54 = vmul.f32 0.5, %v687_v16 }
 0x260   : > { %v689_v12 = vsub.f32 1.5, %v688_v54 }
 0x261   : > { %v1189_v52 = vpop.eup %1188 }
 0x262   : > { %v690_v55 = vmul.f32 %v1187_v3, %v689_v12  ;;  %v696_v48 = vmul.f32 %v1189_v52, %v616_v37  ;;  %vm702_vm15 = vweird.f32 %v1189_v52 }
 0x263   : > { %vm703_vm1 = vmor %vm701_vm0, %vm702_vm15 }
 0x264   : > { %v697_v61 = vmul.f32 %v1189_v52, %v696_v48  ;;  %v694_v60 = vsel %vm693_vm14, %v1187_v3, %v690_v55 }
 0x265   : > { %v791_v38 = vmul.f32 %v694_v60, %v1508_v57 }
 0x266   : > { %v698_v39 = vmul.f32 0.5, %v697_v61 }
 0x267   : > { %v811_v32 = vmul.f32 %v1473_v46, %v791_v38 }
 0x268   : > { %v699_v31 = vsub.f32 1.5, %v698_v39 }
 0x269   : > { %v831_v4 = vadd.f32 %v1479_v56, %v811_v32 }
 0x26a   : > { %v700_v17 = vmul.f32 %v1189_v52, %v699_v31 }
 0x26b   : > { %v847_v57 = vmax.f32 %v831_v4, 0.0 }
 0x26c   : > { %v704_v58 = vsel %vm703_vm1, %v1189_v52, %v700_v17 }
 0x26d   : > { %v792_v33 = vmul.f32 %v704_v58, %v1535_v18 }
 0x26f   : > { %v812_v63 = vmul.f32 %v1473_v46, %v792_v33 }
 0x271   : > { %v832_v5 = vadd.f32 %v1479_v56, %v812_v63 }
 0x273   : > { %v848_v29 = vmax.f32 %v832_v5, 0.0 }
 0x275   : > { %v860_v59 = vpack.c.bf16 %v848_v29, %v847_v57 }
 0x277   : > { %956 = vmatmul.bf16.gmra.mxu1 %v860_v59 }
 0x279   : > { %v962_v2 = vpop.f32.mrf.mxu2 }
 0x27a   : > { %v963_v6 = vadd.f32 %v1722_v49, %v962_v2 }
 0x27c   : > { %991 = vst.msk [vmem:[%s1729_s22 + $0x40] sm:$0xff] %vm982_vm11, %v963_v6 }
 0x281   : > { %v964_v23 = vpop.f32.mrf.mxu2 }
 0x282   : > { %v965_v46 = vadd.f32 %v1722_v49, %v964_v23 }
 0x283   : > { %v947_v18 = vpop.f32.mrf.mxu1 }
 0x284   : > { %v948_v44 = vadd.f32 %v1722_v49, %v947_v18  ;;  %992 = vst.msk [vmem:[%s1729_s22 + $0x48] sm:$0xff] %vm982_vm11, %v965_v46 }
 0x286   : > { %985 = vst.msk [vmem:[%s1729_s22 + $0x10] sm:$0xff] %vm982_vm11, %v948_v44 }
 0x289   : > { %v967_v56 = vpop.f32.mrf.mxu2 }
 0x28a   : > { %v968_v35 = vadd.f32 %v1722_v49, %v967_v56 }
 0x28b   : > { %v949_v7 = vpop.f32.mrf.mxu1 }
 0x28c   : > { %v950_v10 = vadd.f32 %v1722_v49, %v949_v7  ;;  %993 = vst.msk [vmem:[%s1729_s22 + $0x50] sm:$0xff] %vm982_vm11, %v968_v35 }
 0x28e   : > { %986 = vst.msk [vmem:[%s1729_s22 + $0x18] sm:$0xff] %vm982_vm11, %v950_v10 }
 0x291   : > { %v969_v8 = vpop.f32.mrf.mxu2 }
 0x292   : > { %v970_v15 = vadd.f32 %v1722_v49, %v969_v8 }
 0x293   : > { %v952_v22 = vpop.f32.mrf.mxu1 }
 0x294   : > { %v953_v45 = vadd.f32 %v1722_v49, %v952_v22  ;;  %994 = vst.msk [vmem:[%s1729_s22 + $0x58] sm:$0xff] %vm982_vm11, %v970_v15 }
 0x296   : > { %987 = vst.msk [vmem:[%s1729_s22 + $0x20] sm:$0xff] %vm982_vm11, %v953_v45 }
 0x299   : > { %v972_v41 = vpop.f32.mrf.mxu2 }
 0x29a   : > { %v973_v21 = vadd.f32 %v1722_v49, %v972_v41 }
 0x29b   : > { %v954_v19 = vpop.f32.mrf.mxu1 }
 0x29c   : > { %v955_v34 = vadd.f32 %v1722_v49, %v954_v19  ;;  %995 = vst.msk [vmem:[%s1729_s22 + $0x60] sm:$0xff] %vm982_vm11, %v973_v21 }
 0x29e   : > { %988 = vst.msk [vmem:[%s1729_s22 + $0x28] sm:$0xff] %vm982_vm11, %v955_v34 }
 0x2a1   : > { %v974_v42 = vpop.f32.mrf.mxu2 }
 0x2a2   : > { %v975_v51 = vadd.f32 %v1722_v49, %v974_v42 }
 0x2a4   : > { %996 = vst.msk [vmem:[%s1729_s22 + $0x68] sm:$0xff] %vm982_vm11, %v975_v51 }
 0x2a9   : > { %v977_v20 = vpop.f32.mrf.mxu2 }
 0x2aa   : > { %v978_v25 = vadd.f32 %v1722_v49, %v977_v20 }
 0x2ac   : > { %997 = vst.msk [vmem:[%s1729_s22 + $0x70] sm:$0xff] %vm982_vm11, %v978_v25 }
 0x2b1   : > { %v979_v47 = vpop.f32.mrf.mxu2 }
 0x2b2   : > { %v980_v53 = vadd.f32 %v1722_v49, %v979_v47 }
 0x2b4   : > { %998 = vst.msk [vmem:[%s1729_s22 + $0x78] sm:$0xff] %vm982_vm11, %v980_v53 }
 0x2f4   : > { %v957_v26 = vpop.f32.mrf.mxu1 }
 0x2f5   : > { %v958_v62 = vadd.f32 %v1722_v49, %v957_v26 }
 0x2f7   : > { %989 = vst.msk [vmem:[%s1729_s22 + $0x30] sm:$0xff] %vm982_vm11, %v958_v62 }
 0x2fc   : > { %v959_v50 = vpop.f32.mrf.mxu1 }
 0x2fd   : > { %v960_v24 = vadd.f32 %v1722_v49, %v959_v50 }
 0x2ff   : > { %990 = vst.msk [vmem:[%s1729_s22 + $0x38] sm:$0xff] %vm982_vm11, %v960_v24 }
 0x300 PF: > { %s17_s24 = sadd.s32 1, %s1196_s24  }
 0x301   : > { %p14_p4 = scmp.ge.s32.totalorder %s17_s24, 10  }
 0x303   :  { %16 = sbr.rel (!%p14_p4) target bundleno = 1 (0x1), region = 78 }

</bundles_post_ra>
